<compile_context>
chip_gen: v7x
topology: tpu7x:2x2x1
jax: 0.10.0
libtpu: 0.0.40
codegen_flags: <defaults>
</compile_context>

<pallas_src>
import functools

import jax
import jax.numpy as jnp
from jax.experimental import pallas as pl
from jax.experimental.pallas import tpu as pltpu


def _round_up(x, m):
    return ((x + m - 1) // m) * m


# -----------------------------------------------------------------------------
# Fused kernel
# -----------------------------------------------------------------------------
def _fused_cam_kernel(hw_feat, n_chan,
                      label_ref, fcw_ref, fp_ref, r_ref, img_ref,
                      mean_ref, std_ref,
                      cam_ref, img_out_ref, overlay_ref):
    # label_ref:   SMEM (1,)            int32   chosen class
    # fcw_ref:     VMEM [num_cls, C]    f32     full fc weight
    # fp_ref:      VMEM [C, HWf_pad]    f32     feature map (spatial padded to 128k)
    # r_ref:       VMEM [HWf_pad, HWi_pad] f32  0/1 nearest-neighbour upsample matrix
    # img_ref:     VMEM [3, HWi_pad]    f32     normalized input image
    # mean_ref:    SMEM (3,)            f32     mean * 255
    # std_ref:     SMEM (3,)            f32     std  * 255
    # cam_ref:     VMEM [1, HWf_pad]    f32     normalized CAM in [0, 255]
    # img_out_ref: VMEM [3, HWi_pad]    f32     denormalized image in [0, 255]
    # overlay_ref: VMEM [3, HWi_pad]    f32     0.5*heat + 0.3*img255
    lbl = label_ref[0]

    # --- fc weight row for the label (one-hot mask + sublane reduce; no host sync)
    rows = jax.lax.broadcasted_iota(jnp.int32, fcw_ref.shape, 0)
    onehot = (rows == lbl).astype(jnp.float32)
    w = jnp.sum(onehot * fcw_ref[...], axis=0, keepdims=True)          # [1, C]

    # --- CAM matvec on the MXU (padded spatial lanes contribute zeros)
    s = jnp.dot(w, fp_ref[...], preferred_element_type=jnp.float32)    # [1, HWf_pad]

    # --- normalize: cam -= min; cam /= max; cam *= 255   (mask out padded lanes)
    lane = jax.lax.broadcasted_iota(jnp.int32, s.shape, 1)
    valid = lane < hw_feat
    mn = jnp.min(jnp.where(valid, s, jnp.inf), axis=1, keepdims=True)   # [1, 1]
    s0 = s - mn
    mx = jnp.max(jnp.where(valid, s0, -jnp.inf), axis=1, keepdims=True)
    inv = pl.reciprocal(jnp.maximum(mx, 1e-12), approx=True)            # EUP slot
    cam = jnp.clip(jnp.where(valid, s0 * (255.0 * inv), 0.0), 0.0, 255.0)
    cam_ref[...] = cam

    # --- nearest-neighbour upsample to image resolution: heat = cam @ R (MXU)
    heat = jnp.dot(cam, r_ref[...], preferred_element_type=jnp.float32)  # [1, HWi_pad]
    heat_row = heat[0, :]

    # --- per-channel denormalize (*255 folded into SMEM scalars) + blend
    for c in range(n_chan):
        row = jnp.clip(img_ref[c, :] * std_ref[c] + mean_ref[c], 0.0, 255.0)
        img_out_ref[c, :] = row
        overlay_ref[c, :] = 0.5 * heat_row + 0.3 * row


# -----------------------------------------------------------------------------
# Cam.forward equivalent (glue in plain JAX, everything hot in one Pallas call)
# -----------------------------------------------------------------------------
def cam_forward(img, label, logits, fp, fc_weight, mean, std):
    """img: [1,3,H,W] f32 (normalized), fp: [1,C,Hf,Wf] f32, fc_weight: [ncls,C]."""
    _, Cin, H, W = img.shape
    _, Cf, Hf, Wf = fp.shape
    hw_feat, hw_img = Hf * Wf, H * W
    hw_feat_p = _round_up(hw_feat, 128)     # lane-dense CAM output
    hw_img_p = _round_up(hw_img, 128)       # lane-dense image/overlay output

    # `if not label: label = out.argmax(dim=1)` -- kept on device (no int()/host sync)
    if not label:
        label_arr = jnp.argmax(logits, axis=1).astype(jnp.int32).reshape(1)
    else:
        label_arr = jnp.asarray([label], dtype=jnp.int32)

    fp_pad = jnp.pad(fp.reshape(Cf, hw_feat).astype(jnp.float32),
                     ((0, 0), (0, hw_feat_p - hw_feat)))
    img_pad = jnp.pad(img.reshape(Cin, hw_img).astype(jnp.float32),
                      ((0, 0), (0, hw_img_p - hw_img)))

    # nearest-neighbour upsample as a 0/1 matrix so it runs on the MXU in-kernel
    # TODO(synk): cv2.resize is bilinear + cv2.applyColorMap pseudo-color; here we
    #             use nearest-neighbour and a grayscale heat map instead.
    hf = (jnp.arange(H) * Hf) // H
    wf = (jnp.arange(W) * Wf) // W
    src = (hf[:, None] * Wf + wf[None, :]).reshape(-1)                  # [H*W]
    R = jax.nn.one_hot(src, hw_feat_p, dtype=jnp.float32).T             # [HWf_pad, H*W]
    R = jnp.pad(R, ((0, 0), (0, hw_img_p - hw_img)))

    mean255 = (mean.astype(jnp.float32) * 255.0).reshape(Cin)
    std255 = (std.astype(jnp.float32) * 255.0).reshape(Cin)

    kernel = functools.partial(_fused_cam_kernel, hw_feat, Cin)

    cam_f, img_f, ovl_f = pl.pallas_call(
        kernel,
        out_shape=(
            jax.ShapeDtypeStruct((1, hw_feat_p), jnp.float32),
            jax.ShapeDtypeStruct((Cin, hw_img_p), jnp.float32),
            jax.ShapeDtypeStruct((Cin, hw_img_p), jnp.float32),
        ),
        in_specs=[
            pl.BlockSpec(memory_space=pltpu.MemorySpace.SMEM),   # label scalar
            pl.BlockSpec(memory_space=pltpu.MemorySpace.VMEM),   # fc weight
            pl.BlockSpec(memory_space=pltpu.MemorySpace.VMEM),   # feature map
            pl.BlockSpec(memory_space=pltpu.MemorySpace.VMEM),   # upsample matrix
            pl.BlockSpec(memory_space=pltpu.MemorySpace.VMEM),   # image
            pl.BlockSpec(memory_space=pltpu.MemorySpace.SMEM),   # mean*255
            pl.BlockSpec(memory_space=pltpu.MemorySpace.SMEM),   # std*255
        ],
        out_specs=(
            pl.BlockSpec(memory_space=pltpu.MemorySpace.VMEM),
            pl.BlockSpec(memory_space=pltpu.MemorySpace.VMEM),
            pl.BlockSpec(memory_space=pltpu.MemorySpace.VMEM),
        ),
    )(label_arr, fc_weight.astype(jnp.float32), fp_pad, R, img_pad,
      mean255, std255)

    cam = cam_f[0, :hw_feat].reshape(Hf, Wf)
    cam_img = cam.astype(jnp.uint8)                                     # np.uint8(cam*255)
    img255 = img_f[:, :hw_img].reshape(Cin, H, W).transpose(1, 2, 0)    # [H, W, 3]
    img_u8 = img255.astype(jnp.uint8)
    overlay = ovl_f[:, :hw_img].reshape(Cin, H, W).transpose(1, 2, 0)   # 0.5*heat + 0.3*img
    return cam_img, img_u8, overlay


if __name__ == "__main__":
    key = jax.random.PRNGKey(0)
    k_img, k_fp, k_fc, k_logit = jax.random.split(key, 4)

    # Small synthetic shapes consistent with the module's forward:
    B, Cin, H, W = 1, 3, 16, 16          # input image (NCHW)
    Cf, Hf, Wf = 8, 8, 8                 # hooked 'layer4' feature map
    num_classes = 10

    # TODO(synk): the ResNet-18 backbone + forward hook have no Pallas
    #             equivalent; feature map and logits are synthetic here.
    img = jax.random.normal(k_img, (B, Cin, H, W), dtype=jnp.float32)
    fp = jax.random.normal(k_fp, (B, Cf, Hf, Wf), dtype=jnp.float32)
    fc_weight = jax.random.normal(k_fc, (num_classes, Cf), dtype=jnp.float32) * 0.1
    logits = jax.random.normal(k_logit, (B, num_classes), dtype=jnp.float32)

    mean = jnp.array([0.485, 0.456, 0.406], dtype=jnp.float32)
    std = jnp.array([0.229, 0.224, 0.225], dtype=jnp.float32)

    cam_img, img_u8, overlay = cam_forward(img, None, logits, fp, fc_weight, mean, std)
    jax.block_until_ready((cam_img, img_u8, overlay))

    assert cam_img.shape == (Hf, Wf) and cam_img.dtype == jnp.uint8
    assert img_u8.shape == (H, W, Cin) and img_u8.dtype == jnp.uint8
    assert overlay.shape == (H, W, Cin) and overlay.dtype == jnp.float32

    # --- pure-JAX reference check (host sync is fine here, it's only a test) ---
    lbl = jnp.argmax(logits, axis=1)[0]
    w = fc_weight[lbl]
    cam_ref = jnp.einsum('c,chw->hw', w, fp[0])
    cam_ref = cam_ref - cam_ref.min()
    cam_ref = jnp.clip(cam_ref / jnp.maximum(cam_ref.max(), 1e-12) * 255.0, 0.0, 255.0)
    img_ref = jnp.clip((img[0] * std[:, None, None] + mean[:, None, None]) * 255.0,
                       0.0, 255.0).transpose(1, 2, 0)
    hh = (jnp.arange(H) * Hf) // H
    ww = (jnp.arange(W) * Wf) // W
    heat_ref = cam_ref[hh][:, ww]
    ovl_ref = 0.5 * heat_ref[:, :, None] + 0.3 * img_ref

    assert jnp.max(jnp.abs(cam_img.astype(jnp.int32) -
                           cam_ref.astype(jnp.uint8).astype(jnp.int32))) <= 1
    assert jnp.max(jnp.abs(img_u8.astype(jnp.int32) -
                           img_ref.astype(jnp.uint8).astype(jnp.int32))) <= 1
    assert jnp.max(jnp.abs(overlay - ovl_ref)) <= 1.0

    print("KERNEL_OK")
</pallas_src>

<mosaic_0001>
module attributes {stable_mosaic.version = 11 : i64} {
  func.func @_fused_cam_kernel(%arg0: memref<1xi32, #tpu.memory_space<smem>>, %arg1: memref<10x8xf32, #tpu.memory_space<vmem>>, %arg2: memref<8x128xf32, #tpu.memory_space<vmem>>, %arg3: memref<128x256xf32, #tpu.memory_space<vmem>>, %arg4: memref<3x256xf32, #tpu.memory_space<vmem>>, %arg5: memref<3xf32, #tpu.memory_space<smem>>, %arg6: memref<3xf32, #tpu.memory_space<smem>>, %arg7: memref<1x128xf32, #tpu.memory_space<vmem>>, %arg8: memref<3x256xf32, #tpu.memory_space<vmem>>, %arg9: memref<3x256xf32, #tpu.memory_space<vmem>>) attributes {dimension_semantics = [], scalar_prefetch = 0 : i64, scratch_operands = 0 : i64, tpu.core_type = #tpu.core_type<tc>} {
    %c0 = arith.constant 0 : index
    %0 = memref.load %arg0[%c0] : memref<1xi32, #tpu.memory_space<smem>>
    %1 = tpu.iota {dimensions = array<i32: 0>} : vector<10x8xi32>
    %2 = vector.broadcast %0 : i32 to vector<10x8xi32>
    %3 = arith.cmpi eq, %1, %2 : vector<10x8xi32>
    %4 = arith.extui %3 : vector<10x8xi1> to vector<10x8xi32>
    %5 = arith.sitofp %4 : vector<10x8xi32> to vector<10x8xf32>
    %c0_0 = arith.constant 0 : index
    %c0_1 = arith.constant 0 : index
    %6 = vector.load %arg1[%c0_0, %c0_1] : memref<10x8xf32, #tpu.memory_space<vmem>>, vector<10x8xf32>
    %7 = arith.mulf %5, %6 : vector<10x8xf32>
    %cst = arith.constant dense<0.000000e+00> : vector<8xf32>
    %8 = vector.multi_reduction <add>, %7, %cst [0] : vector<10x8xf32> to vector<8xf32>
    %9 = vector.shape_cast %8 : vector<8xf32> to vector<1x8xf32>
    %c0_2 = arith.constant 0 : index
    %c0_3 = arith.constant 0 : index
    %10 = vector.load %arg2[%c0_2, %c0_3] : memref<8x128xf32, #tpu.memory_space<vmem>>, vector<8x128xf32>
    %cst_4 = arith.constant dense<0.000000e+00> : vector<1x128xf32>
    %11 = tpu.matmul %9, %10, %cst_4 {dimension_numbers = #tpu.dot_dimension_numbers<[1], [0], [0], [1], [0, 0, 1, 1], [], []>} : vector<1x8xf32>, vector<8x128xf32>, vector<1x128xf32> -> vector<1x128xf32>
    %12 = tpu.iota {dimensions = array<i32: 1>} : vector<1x128xi32>
    %c64_i32 = arith.constant 64 : i32
    %13 = vector.broadcast %c64_i32 : i32 to vector<1x128xi32>
    %14 = arith.cmpi slt, %12, %13 : vector<1x128xi32>
    %cst_5 = arith.constant 0x7F800000 : f32
    %15 = vector.broadcast %cst_5 : f32 to vector<1x128xf32>
    %16 = arith.select %14, %11, %15 : vector<1x128xi1>, vector<1x128xf32>
    %cst_6 = arith.constant dense<0x7F800000> : vector<1xf32>
    %17 = vector.multi_reduction <minimumf>, %16, %cst_6 [1] : vector<1x128xf32> to vector<1xf32>
    %18 = vector.shape_cast %17 : vector<1xf32> to vector<1x1xf32>
    %19 = vector.broadcast %18 : vector<1x1xf32> to vector<1x128xf32>
    %20 = arith.subf %11, %19 : vector<1x128xf32>
    %cst_7 = arith.constant 0xFF800000 : f32
    %21 = vector.broadcast %cst_7 : f32 to vector<1x128xf32>
    %22 = arith.select %14, %20, %21 : vector<1x128xi1>, vector<1x128xf32>
    %cst_8 = arith.constant dense<0xFF800000> : vector<1xf32>
    %23 = vector.multi_reduction <maximumf>, %22, %cst_8 [1] : vector<1x128xf32> to vector<1xf32>
    %24 = vector.shape_cast %23 : vector<1xf32> to vector<1x1xf32>
    %cst_9 = arith.constant 9.99999996E-13 : f32
    %25 = vector.broadcast %cst_9 : f32 to vector<1x1xf32>
    %26 = arith.maximumf %24, %25 : vector<1x1xf32>
    %27 = tpu.reciprocal %26 {approx = true} : vector<1x1xf32> -> vector<1x1xf32>
    %cst_10 = arith.constant 2.550000e+02 : f32
    %28 = vector.broadcast %cst_10 : f32 to vector<1x1xf32>
    %29 = arith.mulf %28, %27 : vector<1x1xf32>
    %30 = vector.broadcast %29 : vector<1x1xf32> to vector<1x128xf32>
    %31 = arith.mulf %20, %30 : vector<1x128xf32>
    %cst_11 = arith.constant 0.000000e+00 : f32
    %32 = vector.broadcast %cst_11 : f32 to vector<1x128xf32>
    %33 = arith.select %14, %31, %32 : vector<1x128xi1>, vector<1x128xf32>
    %cst_12 = arith.constant 0.000000e+00 : f32
    %cst_13 = arith.constant 2.550000e+02 : f32
    %34 = vector.broadcast %cst_12 : f32 to vector<1x128xf32>
    %35 = arith.maximumf %34, %33 : vector<1x128xf32>
    %36 = vector.broadcast %cst_13 : f32 to vector<1x128xf32>
    %37 = arith.minimumf %36, %35 : vector<1x128xf32>
    %c0_14 = arith.constant 0 : index
    %c0_15 = arith.constant 0 : index
    %38 = vector.load %arg7[%c0_14, %c0_15] : memref<1x128xf32, #tpu.memory_space<vmem>>, vector<1x128xf32>
    tpu.vector_store %arg7[%c0_14, %c0_15], %37 {strides = array<i32>} : memref<1x128xf32, #tpu.memory_space<vmem>>, vector<1x128xf32>,
    %c0_16 = arith.constant 0 : index
    %c0_17 = arith.constant 0 : index
    %39 = vector.load %arg3[%c0_16, %c0_17] : memref<128x256xf32, #tpu.memory_space<vmem>>, vector<128x256xf32>
    %cst_18 = arith.constant dense<0.000000e+00> : vector<1x256xf32>
    %40 = tpu.matmul %37, %39, %cst_18 {dimension_numbers = #tpu.dot_dimension_numbers<[1], [0], [0], [1], [0, 0, 1, 1], [], []>} : vector<1x128xf32>, vector<128x256xf32>, vector<1x256xf32> -> vector<1x256xf32>
    %41 = vector.shape_cast %40 : vector<1x256xf32> to vector<256xf32>
    %c0_19 = arith.constant 0 : index
    %c0_20 = arith.constant 0 : index
    %42 = vector.load %arg4[%c0_19, %c0_20] : memref<3x256xf32, #tpu.memory_space<vmem>>, vector<1x256xf32>
    %43 = vector.shape_cast %42 : vector<1x256xf32> to vector<256xf32>
    %c0_21 = arith.constant 0 : index
    %44 = memref.load %arg6[%c0_21] : memref<3xf32, #tpu.memory_space<smem>>
    %45 = vector.broadcast %44 : f32 to vector<256xf32>
    %46 = arith.mulf %43, %45 : vector<256xf32>
    %c0_22 = arith.constant 0 : index
    %47 = memref.load %arg5[%c0_22] : memref<3xf32, #tpu.memory_space<smem>>
    %48 = vector.broadcast %47 : f32 to vector<256xf32>
    %49 = arith.addf %46, %48 : vector<256xf32>
    %cst_23 = arith.constant 0.000000e+00 : f32
    %cst_24 = arith.constant 2.550000e+02 : f32
    %50 = vector.broadcast %cst_23 : f32 to vector<256xf32>
    %51 = arith.maximumf %50, %49 : vector<256xf32>
    %52 = vector.broadcast %cst_24 : f32 to vector<256xf32>
    %53 = arith.minimumf %52, %51 : vector<256xf32>
    %c0_25 = arith.constant 0 : index
    %c0_26 = arith.constant 0 : index
    %54 = vector.load %arg8[%c0_25, %c0_26] : memref<3x256xf32, #tpu.memory_space<vmem>>, vector<1x256xf32>
    %55 = vector.shape_cast %54 : vector<1x256xf32> to vector<256xf32>
    %56 = vector.shape_cast %53 : vector<256xf32> to vector<1x256xf32>
    tpu.vector_store %arg8[%c0_25, %c0_26], %56 {strides = array<i32>} : memref<3x256xf32, #tpu.memory_space<vmem>>, vector<1x256xf32>,
    %cst_27 = arith.constant 5.000000e-01 : f32
    %57 = vector.broadcast %cst_27 : f32 to vector<256xf32>
    %58 = arith.mulf %57, %41 : vector<256xf32>
    %cst_28 = arith.constant 3.000000e-01 : f32
    %59 = vector.broadcast %cst_28 : f32 to vector<256xf32>
    %60 = arith.mulf %59, %53 : vector<256xf32>
    %61 = arith.addf %58, %60 : vector<256xf32>
    %c0_29 = arith.constant 0 : index
    %c0_30 = arith.constant 0 : index
    %62 = vector.load %arg9[%c0_29, %c0_30] : memref<3x256xf32, #tpu.memory_space<vmem>>, vector<1x256xf32>
    %63 = vector.shape_cast %62 : vector<1x256xf32> to vector<256xf32>
    %64 = vector.shape_cast %61 : vector<256xf32> to vector<1x256xf32>
    tpu.vector_store %arg9[%c0_29, %c0_30], %64 {strides = array<i32>} : memref<3x256xf32, #tpu.memory_space<vmem>>, vector<1x256xf32>,
    %c1 = arith.constant 1 : index
    %c0_31 = arith.constant 0 : index
    %65 = vector.load %arg4[%c1, %c0_31] : memref<3x256xf32, #tpu.memory_space<vmem>>, vector<1x256xf32>
    %66 = vector.shape_cast %65 : vector<1x256xf32> to vector<256xf32>
    %c1_32 = arith.constant 1 : index
    %67 = memref.load %arg6[%c1_32] : memref<3xf32, #tpu.memory_space<smem>>
    %68 = vector.broadcast %67 : f32 to vector<256xf32>
    %69 = arith.mulf %66, %68 : vector<256xf32>
    %c1_33 = arith.constant 1 : index
    %70 = memref.load %arg5[%c1_33] : memref<3xf32, #tpu.memory_space<smem>>
    %71 = vector.broadcast %70 : f32 to vector<256xf32>
    %72 = arith.addf %69, %71 : vector<256xf32>
    %cst_34 = arith.constant 0.000000e+00 : f32
    %cst_35 = arith.constant 2.550000e+02 : f32
    %73 = vector.broadcast %cst_34 : f32 to vector<256xf32>
    %74 = arith.maximumf %73, %72 : vector<256xf32>
    %75 = vector.broadcast %cst_35 : f32 to vector<256xf32>
    %76 = arith.minimumf %75, %74 : vector<256xf32>
    %c1_36 = arith.constant 1 : index
    %c0_37 = arith.constant 0 : index
    %77 = vector.load %arg8[%c1_36, %c0_37] : memref<3x256xf32, #tpu.memory_space<vmem>>, vector<1x256xf32>
    %78 = vector.shape_cast %77 : vector<1x256xf32> to vector<256xf32>
    %79 = vector.shape_cast %76 : vector<256xf32> to vector<1x256xf32>
    tpu.vector_store %arg8[%c1_36, %c0_37], %79 {strides = array<i32>} : memref<3x256xf32, #tpu.memory_space<vmem>>, vector<1x256xf32>,
    %cst_38 = arith.constant 5.000000e-01 : f32
    %80 = vector.broadcast %cst_38 : f32 to vector<256xf32>
    %81 = arith.mulf %80, %41 : vector<256xf32>
    %cst_39 = arith.constant 3.000000e-01 : f32
    %82 = vector.broadcast %cst_39 : f32 to vector<256xf32>
    %83 = arith.mulf %82, %76 : vector<256xf32>
    %84 = arith.addf %81, %83 : vector<256xf32>
    %c1_40 = arith.constant 1 : index
    %c0_41 = arith.constant 0 : index
    %85 = vector.load %arg9[%c1_40, %c0_41] : memref<3x256xf32, #tpu.memory_space<vmem>>, vector<1x256xf32>
    %86 = vector.shape_cast %85 : vector<1x256xf32> to vector<256xf32>
    %87 = vector.shape_cast %84 : vector<256xf32> to vector<1x256xf32>
    tpu.vector_store %arg9[%c1_40, %c0_41], %87 {strides = array<i32>} : memref<3x256xf32, #tpu.memory_space<vmem>>, vector<1x256xf32>,
    %c2 = arith.constant 2 : index
    %c0_42 = arith.constant 0 : index
    %88 = vector.load %arg4[%c2, %c0_42] : memref<3x256xf32, #tpu.memory_space<vmem>>, vector<1x256xf32>
    %89 = vector.shape_cast %88 : vector<1x256xf32> to vector<256xf32>
    %c2_43 = arith.constant 2 : index
    %90 = memref.load %arg6[%c2_43] : memref<3xf32, #tpu.memory_space<smem>>
    %91 = vector.broadcast %90 : f32 to vector<256xf32>
    %92 = arith.mulf %89, %91 : vector<256xf32>
    %c2_44 = arith.constant 2 : index
    %93 = memref.load %arg5[%c2_44] : memref<3xf32, #tpu.memory_space<smem>>
    %94 = vector.broadcast %93 : f32 to vector<256xf32>
    %95 = arith.addf %92, %94 : vector<256xf32>
    %cst_45 = arith.constant 0.000000e+00 : f32
    %cst_46 = arith.constant 2.550000e+02 : f32
    %96 = vector.broadcast %cst_45 : f32 to vector<256xf32>
    %97 = arith.maximumf %96, %95 : vector<256xf32>
    %98 = vector.broadcast %cst_46 : f32 to vector<256xf32>
    %99 = arith.minimumf %98, %97 : vector<256xf32>
    %c2_47 = arith.constant 2 : index
    %c0_48 = arith.constant 0 : index
    %100 = vector.load %arg8[%c2_47, %c0_48] : memref<3x256xf32, #tpu.memory_space<vmem>>, vector<1x256xf32>
    %101 = vector.shape_cast %100 : vector<1x256xf32> to vector<256xf32>
    %102 = vector.shape_cast %99 : vector<256xf32> to vector<1x256xf32>
    tpu.vector_store %arg8[%c2_47, %c0_48], %102 {strides = array<i32>} : memref<3x256xf32, #tpu.memory_space<vmem>>, vector<1x256xf32>,
    %cst_49 = arith.constant 5.000000e-01 : f32
    %103 = vector.broadcast %cst_49 : f32 to vector<256xf32>
    %104 = arith.mulf %103, %41 : vector<256xf32>
    %cst_50 = arith.constant 3.000000e-01 : f32
    %105 = vector.broadcast %cst_50 : f32 to vector<256xf32>
    %106 = arith.mulf %105, %99 : vector<256xf32>
    %107 = arith.addf %104, %106 : vector<256xf32>
    %c2_51 = arith.constant 2 : index
    %c0_52 = arith.constant 0 : index
    %108 = vector.load %arg9[%c2_51, %c0_52] : memref<3x256xf32, #tpu.memory_space<vmem>>, vector<1x256xf32>
    %109 = vector.shape_cast %108 : vector<1x256xf32> to vector<256xf32>
    %110 = vector.shape_cast %107 : vector<256xf32> to vector<1x256xf32>
    tpu.vector_store %arg9[%c2_51, %c0_52], %110 {strides = array<i32>} : memref<3x256xf32, #tpu.memory_space<vmem>>, vector<1x256xf32>,
    return
  }
}

</mosaic_0001>

<bundles_post_ra>
// kernel: tpu_custom_call.1
= control target key start
LH: loop header
LB: loop body
LE: loop exit
PB: predicated region body
PF: predicated region fallthrough
CT: control target
= control target key end

     0   :  { %16 = vsyncpa [#allocation4], 0  ;;  %s836_s0 = inlined_call_operand.<no memory space> [shape: s32[1], index: 0, kind: input, shape index: {}]   ;;  %s837_s1 = inlined_call_operand.vmem [shape: f32[10,8], index: 1, kind: input, shape index: {}]   ;;  %s838_s2 = inlined_call_operand.vmem [shape: f32[8,128], index: 2, kind: input, shape index: {}]   ;;  %s839_s3 = inlined_call_operand.hbm [shape: f32[128,256], index: 3, kind: input, shape index: {}]   ;;  %s840_s4 = inlined_call_operand.vmem [shape: f32[3,256], index: 4, kind: input, shape index: {}]   ;;  %s841_s5 = inlined_call_operand.vmem [shape: f32[3], index: 5, kind: input, shape index: {}]   ;;  %s842_s6 = inlined_call_operand.vmem [shape: f32[3], index: 6, kind: input, shape index: {}]   ;;  %s843_s7 = inlined_call_operand.hbm [shape: f32[1,128], index: 7, kind: output, shape index: {0}]   ;;  %s844_s8 = inlined_call_operand.hbm [shape: f32[3,256], index: 8, kind: output, shape index: {1}]   ;;  %s845_s9 = inlined_call_operand.hbm [shape: f32[3,256], index: 9, kind: output, shape index: {2}]  }
   0x1   :  { %17 = vsyncpa [#allocation6], 0 }
   0x2   :  { %18 = vsyncpa [#allocation9], 0 }
   0x3   :  { %19 = vsyncpa [#allocation5], 0 }
   0x4   :  { %20 = vsyncpa [#allocation12], 0  ;;  %s663_s30 = smov [#allocation3]   ;;  %s47_s13 = sshll.u32 %s841_s5, 4  ;;  %s48_s13 = int_to_ptr.vmem [resolvable:$true] %s47_s13 }
   0x5   :  { %s32_s10 = sshll.u32 %s663_s30, 4  ;;  %s541_s16 = scalar_lea.hbm %s839_s3, 4096  ;;  %s33_s10 = int_to_ptr.vmem [resolvable:$true] %s32_s10 }
   0x6   :  { %p542_p0 = scmp.ne.s32.totalorder %s839_s3, %s541_s16  ;;  %p545_p1 = scmp.lt.u32.totalorder %s541_s16, %s839_s3 }
   0x8   :  { %p547_p2 = pnand %p545_p1, %p542_p0 }
   0xa   :  { %550 = shalt.err (!%p547_p2)
}
   0xb   :  { %s551_s21 = scalar_lea.vmem %s33_s10, 4096  ;;  %p556_p4 = scmp.lt.s32.totalorder %s33_s10, %s33_s10 }
   0xc   :  { %p552_p3 = scmp.ne.s32.totalorder %s33_s10, %s551_s21  ;;  %p557_p5 = scmp.lt.s32.totalorder %s551_s21, %s551_s21 }
   0xe   :  { %p558_p6 = por %p557_p5, %p556_p4 }
  0x10   :  { %p559_p7 = pnand %p558_p6, %p552_p3 }
  0x12   :  { %562 = shalt.err (!%p559_p7)
}
  0x13   :  { %s664_s5 = smov 256   ;;  %s665_s22 = smov 16  }
  0x14   :  { %38 = dma.hbm_to_vmem [thread:$0]  %s839_s3, 4096, %s33_s10, [#allocation4], %s664_s5, %s664_s5, %s665_s22  }
  0x15   :  { %s563_s25 = scalar_lea.vmem %s48_s13, 16  ;;  %p568_p9 = scmp.lt.s32.totalorder %s48_s13, %s48_s13 }
  0x16   :  { %p564_p8 = scmp.ne.s32.totalorder %s48_s13, %s563_s25  ;;  %p569_p10 = scmp.lt.s32.totalorder %s563_s25, %s563_s25 }
  0x18   :  { %p570_p11 = por %p569_p10, %p568_p9 }
  0x1a   :  { %p571_p12 = pnand %p570_p11, %p564_p8 }
  0x1c   :  { %574 = shalt.err (!%p571_p12)
}
  0x1d   :  { %s666_s26 = smov [#allocation7]   ;;  %s57_s29 = sshll.u32 %s842_s6, 4  ;;  %s58_s29 = int_to_ptr.vmem [resolvable:$true] %s57_s29 }
  0x1e   :  { %50 = dma.vmem_to_smem %s48_s13, 16, %s666_s26, [#allocation6]  }
  0x1f   :  { %s575_s30 = scalar_lea.vmem %s58_s29, 16  ;;  %p580_p0 = scmp.lt.s32.totalorder %s58_s29, %s58_s29 }
  0x20   :  { %p576_p13 = scmp.ne.s32.totalorder %s58_s29, %s575_s30  ;;  %p581_p1 = scmp.lt.s32.totalorder %s575_s30, %s575_s30 }
  0x22   :  { %p582_p2 = por %p581_p1, %p580_p0 }
  0x24   :  { %p583_p3 = pnand %p582_p2, %p576_p13 }
  0x26   :  { %586 = shalt.err (!%p583_p3)
}
  0x27   :  { %s667_s3 = smov [#allocation8]  }
  0x28   :  { %60 = dma.vmem_to_smem %s58_s29, 16, %s667_s3, [#allocation9]  }
  0x29   :  { %653 = dma.done.wait [#allocation4], 4096  }
  0x2a   :  { %654 = vsyncadd [#allocation4], 4294963200 }
  0x2b   :  { %655 = dma.done.wait [#allocation6], 16  }
  0x2c   :  { %656 = vsyncadd [#allocation6], 4294967280 }
  0x2d   :  { %657 = dma.done.wait [#allocation9], 16  }
  0x2e   :  { %658 = vsyncadd [#allocation9], 4294967280 }
  0x2f   :  { %70 = sfence }
  0x30   :  { %v97_v0 = vld [vmem:[%s838_s2] sm:$0xff]  ;;  %v72_v1 = vlaneseq  ;;  %v668_v2 = vmov 0.0   ;;  %vm669_vm0 = vmmov 0   ;;  %v75_v3 = vstv %s836_s0  ;;  %v83_v8 = vld [vmem:[%s837_s1 + $0x8] sm:$0x3]  ;;  %v195_v27 = vld [vmem:[#allocation3 + $0x18] sm:$0xff] }
  0x31   :  { %491 = vmatprep.subr.mxu0 %v668_v2  ;;  %493 = vmatprep.mubr.msk.f32.mxu0 %vm669_vm0, %v668_v2  ;;  %v82_v5 = vld [vmem:[%s837_s1] sm:$0xff]  ;;  %vm86_vm2 = vcmask 64512   ;;  %vm88_vm4 = vcmask 58368   ;;  %vm175_vm6 = vcmask 1040384   ;;  %v193_v26 = vld [vmem:[#allocation3 + $0x8] sm:$0xff]  ;;  %v194_v30 = vld [vmem:[#allocation3 + $0x10] sm:$0xff] }
  0x32   :  { %492 = vmatpush3.msra.mxu0 %v97_v0  ;;  %v749_v4 = vshrl.u32 %v72_v1, 7  ;;  %288 = vmatprep.mubr.f32.mxu1 %v668_v2  ;;  %v760_v21 = vand.u32 127, %v72_v1  ;;  %v192_v28 = vld [vmem:[#allocation3] sm:$0xff]  ;;  %v496_v29 = vpack.c.bf16 %v195_v27, %v193_v26  ;;  %v197_v31 = vld [vmem:[#allocation3 + $0x28] sm:$0xff]  ;;  %v199_v32 = vld [vmem:[#allocation3 + $0x38] sm:$0xff]  ;;  %s296_s0 = sld [smem:[#allocation8]] }
  0x33   :  { %v498_v33 = vpack.c.bf16 %v194_v30, %v192_v28  ;;  %v500_v34 = vpack.c.bf16 %v199_v32, %v197_v31  ;;  %v196_v35 = vld [vmem:[#allocation3 + $0x20] sm:$0xff]  ;;  %v198_v36 = vld [vmem:[#allocation3 + $0x30] sm:$0xff]  ;;  %v201_v37 = vld [vmem:[#allocation3 + $0x48] sm:$0xff]  ;;  %s484_s1 = sld [smem:[#allocation8 + $0x1]]  ;;  %s487_s16 = sld [smem:[#allocation8 + $0x2]]  ;;  %vm781_vm7 = vcmp.lt.s32.totalorder %v72_v1, 256 }
  0x34   :  { %v74_v6 = vadd.s32 8, %v749_v4  ;;  %vm76_vm1 = vcmp.eq.s32.totalorder %v749_v4, %v75_v3  ;;  %vm173_vm5 = vcmp.lt.s32.totalorder %v760_v21, 64  ;;  %497 = vmatprep.subr.bf16.mxu1 %v496_v29  ;;  %v203_v38 = vld [vmem:[#allocation3 + $0x58] sm:$0xff]  ;;  %v502_v39 = vpack.c.bf16 %v198_v36, %v196_v35  ;;  %v200_v41 = vld [vmem:[#allocation3 + $0x40] sm:$0xff]  ;;  %v202_v42 = vld [vmem:[#allocation3 + $0x50] sm:$0xff]  ;;  %s299_s17 = sld [smem:[#allocation7]] }
  0x35   :  { %v480_v7 = vsel %vm76_vm1, 1.0, %v668_v2  ;;  %499 = vmatpush1.bf16.msra.mxu1 %v498_v33  ;;  %v504_v40 = vpack.c.bf16 %v203_v38, %v201_v37  ;;  %v506_v43 = vpack.c.bf16 %v202_v42, %v200_v41  ;;  %v205_v48 = vld [vmem:[#allocation3 + $0x68] sm:$0xff]  ;;  %v207_v49 = vld [vmem:[#allocation3 + $0x78] sm:$0xff]  ;;  %v204_v51 = vld [vmem:[#allocation3 + $0x60] sm:$0xff]  ;;  %s485_s18 = sld [smem:[#allocation7 + $0x1]]  ;;  %s488_s19 = sld [smem:[#allocation7 + $0x2]] }
  0x36   :  { %vm77_vm3 = vcmp.eq.s32.totalorder %v74_v6, %v75_v3  ;;  %v84_v9 = vmul.f32 %v480_v7, %v82_v5  ;;  %501 = vmatprep.subr.bf16.mxu1 %v500_v34  ;;  %v508_v50 = vpack.c.bf16 %v207_v49, %v205_v48  ;;  %v206_v52 = vld [vmem:[#allocation3 + $0x70] sm:$0xff]  ;;  %v209_v54 = vld [vmem:[#allocation3 + $0x88] sm:$0xff]  ;;  %v211_v55 = vld [vmem:[#allocation3 + $0x98] sm:$0xff]  ;;  %s671_s26 = smov [#allocation10]  }
  0x37   :  { %v481_v10 = vsel %vm77_vm3, 1.0, %v668_v2  ;;  %v510_v53 = vpack.c.bf16 %v206_v52, %v204_v51  ;;  %v512_v56 = vpack.c.bf16 %v211_v55, %v209_v54  ;;  %v208_v57 = vld [vmem:[#allocation3 + $0x80] sm:$0xff]  ;;  %v210_v58 = vld [vmem:[#allocation3 + $0x90] sm:$0xff]  ;;  %v213_v60 = vld [vmem:[#allocation3 + $0xa8] sm:$0xff]  ;;  %s442_s27 = sshll.u32 %s671_s26, 4  ;;  %s443_s27 = int_to_ptr.vmem [resolvable:$true] %s442_s27 }
  0x38   :  { %v85_v11 = vmul.f32 %v481_v10, %v83_v8  ;;  %v87_v12 = vsel %vm86_vm2, %v84_v9, 0.0  ;;  %v514_v59 = vpack.c.bf16 %v210_v58, %v208_v57  ;;  %v215_v61 = vld [vmem:[#allocation3 + $0xb8] sm:$0xff]  ;;  %v212_v63 = vld [vmem:[#allocation3 + $0xa0] sm:$0xff]  ;;  %v214_v0 = vld [vmem:[#allocation3 + $0xb0] sm:$0xff]  ;;  %v297_v26 = vstv %s296_s0 }
  0x39   :  { %503 = vmatpush1.bf16.msra.mxu1 %v502_v39  ;;  %v516_v62 = vpack.c.bf16 %v215_v61, %v213_v60  ;;  %v518_v2 = vpack.c.bf16 %v214_v0, %v212_v63  ;;  %v217_v3 = vld [vmem:[#allocation3 + $0xc8] sm:$0xff]  ;;  %v219_v5 = vld [vmem:[#allocation3 + $0xd8] sm:$0xff]  ;;  %v216_v7 = vld [vmem:[#allocation3 + $0xc0] sm:$0xff]  ;;  %v347_v27 = vstv %s484_s1  ;;  %v393_v29 = vstv %s487_s16 }
  0x3a   :  { %v89_v13 = vsel %vm88_vm4, %v85_v11, 0.0  ;;  %505 = vmatprep.subr.bf16.mxu1 %v504_v40  ;;  %v520_v6 = vpack.c.bf16 %v219_v5, %v217_v3  ;;  %v218_v8 = vld [vmem:[#allocation3 + $0xd0] sm:$0xff]  ;;  %v221_v10 = vld [vmem:[#allocation3 + $0xe8] sm:$0xff]  ;;  %v223_v11 = vld [vmem:[#allocation3 + $0xf8] sm:$0xff]  ;;  %v300_v33 = vstv %s299_s17 }
  0x3b   :  { %v90_v14 = vadd.f32 %v89_v13, %v87_v12  ;;  %v522_v9 = vpack.c.bf16 %v218_v8, %v216_v7  ;;  %v220_v12 = vld [vmem:[#allocation3 + $0xe0] sm:$0xff]  ;;  %v524_v13 = vpack.c.bf16 %v223_v11, %v221_v10  ;;  %v350_v34 = vstv %s485_s18 }
  0x3c   :  { %v483_v21 = vld [vmem:[%s840_s4 + $0x1] ss:$4 sm:$0x3]  ;;  %v486_v28 = vld [vmem:[%s840_s4 + $0x2] ss:$4 sm:$0x3]  ;;  %v396_v35 = vstv %s488_s19 }
  0x3d   :  { %v91_v15 = vrot.slane %v90_v14, 4  ;;  %507 = vmatpush1.bf16.msra.mxu1 %v506_v43  ;;  %v348_v31 = vmul.f32 %v483_v21, %v347_v27  ;;  %v394_v32 = vmul.f32 %v486_v28, %v393_v29 }
  0x3e   :  { %509 = vmatprep.subr.bf16.mxu1 %v508_v50 }
  0x3f   :  { %v92_v16 = vadd.f32 %v91_v15, %v90_v14  ;;  %v222_v14 = vld [vmem:[#allocation3 + $0xf0] sm:$0xff]  ;;  %v351_v37 = vadd.f32 %v350_v34, %v348_v31  ;;  %v397_v38 = vadd.f32 %v396_v35, %v394_v32 }
  0x40   :  { %v526_v15 = vpack.c.bf16 %v222_v14, %v220_v12 }
  0x41   :  { %v93_v17 = vrot.slane %v92_v16, 2  ;;  %511 = vmatpush1.bf16.msra.mxu1 %v510_v53  ;;  %v352_v40 = vmax.f32 %v351_v37, 0.0  ;;  %v398_v41 = vmax.f32 %v397_v38, 0.0 }
  0x42   :  { %513 = vmatprep.subr.bf16.mxu1 %v512_v56 }
  0x43   :  { %v94_v18 = vadd.f32 %v93_v17, %v92_v16  ;;  %v353_v43 = vmin.f32 %v352_v40, 255.0 }
  0x45   :  { %v95_v19 = vrot.slane %v94_v18, 1  ;;  %515 = vmatpush1.bf16.msra.mxu1 %v514_v59  ;;  %355 = vst.msk [vmem:[#allocation11 + $0x1] ss:$4 sm:$0x3] %vm781_vm7, %v353_v43 }
  0x46   :  { %517 = vmatprep.subr.bf16.mxu1 %v516_v62 }
  0x47   :  { %v96_v20 = vadd.f32 %v95_v19, %v94_v18 }
  0x49   :  { %494 = vmatmul.mubr.msk.f32.vlgmr.msra.gmra.mrb[0].mxu0 %vm86_vm2, %v96_v20  ;;  %519 = vmatpush1.bf16.msra.mxu1 %v518_v2 }
  0x4a   :  { %521 = vmatprep.subr.bf16.mxu1 %v520_v6 }
  0x4d   :  { %523 = vmatpush1.bf16.msra.mxu1 %v522_v9 }
  0x4e   :  { %525 = vmatprep.subr.bf16.mxu1 %v524_v13 }
  0x51   :  { %527 = vmatpush1.bf16.msra.mxu1 %v526_v15 }
 0x11c   :  { %v167_v22 = vpop.f32.mrb[0].mxu0 }
 0x11d   :  { %v495_v23 = vpop.f32.mrb[1].mxu0  ;;  %v174_v24 = vsel %vm173_vm5, %v167_v22, inf }
 0x11e   :  { %v176_v25 = vsel %vm175_vm6, %v174_v24, inf }
 0x11f   :  { %177 = vmin.xlane.f32.xlu0 %v176_v25  ;;  %v295_v25 = vld [vmem:[%s840_s4] ss:$4 sm:$0x3]  ;;  %s670_s4 = smov [#allocation11]  }
 0x120   :  { %v298_v30 = vmul.f32 %v297_v26, %v295_v25  ;;  %s452_s25 = sshll.u32 %s670_s4, 4  ;;  %s453_s25 = int_to_ptr.vmem [resolvable:$true] %s452_s25 }
 0x121   :  { %s587_s28 = scalar_lea.vmem %s453_s25, 128  ;;  %p592_p5 = scmp.lt.s32.totalorder %s453_s25, %s453_s25 }
 0x122   :  { %v301_v36 = vadd.f32 %v300_v33, %v298_v30  ;;  %p588_p4 = scmp.ne.s32.totalorder %s453_s25, %s587_s28  ;;  %p593_p6 = scmp.lt.s32.totalorder %s587_s28, %s587_s28 }
 0x124   :  { %v302_v39 = vmax.f32 %v301_v36, 0.0  ;;  %p594_p7 = por %p593_p6, %p592_p5 }
 0x126   :  { %v303_v42 = vmin.f32 %v302_v39, 255.0  ;;  %p595_p8 = pnand %p594_p7, %p588_p4 }
 0x128   :  { %308 = vst.msk [vmem:[#allocation11] ss:$4 sm:$0x3] %vm781_vm7, %v303_v42 }
 0x1ac   :  { %v178_v44 = vpop.xlane.xlu0 %177 }
 0x1ad   :  { %v179_v45 = vsub.f32 %v167_v22, %v178_v44  ;;  %v399_v44 = vmin.f32 %v398_v41, 255.0 }
 0x1af   :  { %v180_v46 = vsel %vm173_vm5, %v179_v45, -inf  ;;  %401 = vst.msk [vmem:[#allocation11 + $0x2] ss:$4 sm:$0x3] %vm781_vm7, %v399_v44 }
 0x1b0   :  { %v181_v47 = vsel %vm175_vm6, %v180_v46, -inf }
 0x1b1   :  { %182 = vmax.xlane.f32.xlu0 %v181_v47 }
 0x23e   :  { %v183_v16 = vpop.xlane.xlu0 %182 }
 0x23f   :  { %v184_v17 = vmax.f32 %v183_v16, 1e-12 }
 0x241   :  { %539 = vrcp.f32 %v184_v17 }
 0x24b   :  { %v540_v18 = vpop.eup %539 }
 0x24c   :  { %v186_v19 = vmul.f32 255.0, %v540_v18 }
 0x24e   :  { %v187_v20 = vmul.f32 %v186_v19, %v179_v45 }
 0x250   :  { %v188_v22 = vsel %vm173_vm5, %v187_v20, 0.0 }
 0x251   :  { %v189_v23 = vmax.f32 %v188_v22, 0.0 }
 0x253   :  { %v190_v24 = vmin.f32 %v189_v23, 255.0 }
 0x255   :  { %289 = vmatmul.mubr.f32.vlgmr.msra.gmra.mrb[0].mxu1 %v190_v24  ;;  %191 = vst [vmem:[#allocation10] sm:$0x1] %v190_v24 }
 0x256   :  { %598 = shalt.err (!%p595_p8)
}
 0x257   :  { %s599_s3 = scalar_lea.hbm %s844_s8, 128 }
 0x258   :  { %p600_p9 = scmp.ne.s32.totalorder %s844_s8, %s599_s3  ;;  %p603_p10 = scmp.lt.u32.totalorder %s599_s3, %s844_s8 }
 0x25a   :  { %p605_p11 = pnand %p603_p10, %p600_p9 }
 0x25c   :  { %608 = shalt.err (!%p605_p11)
}
 0x25d   :  { %455 = dma.vmem_to_hbm [thread:$0]  %s453_s25, 128, %s844_s8, [#allocation12]  }
 0x25e   :  { %s609_s2 = scalar_lea.vmem %s443_s27, 16  ;;  %s613_s15 = scalar_lea.vmem %s443_s27, 32 }
 0x25f   :  { %p610_p12 = scmp.ne.s32.totalorder %s443_s27, %s609_s2  ;;  %p614_p13 = scmp.lt.s32.totalorder %s443_s27, %s443_s27 }
 0x260   :  { %p615_p0 = scmp.lt.s32.totalorder %s613_s15, %s609_s2 }
 0x262   :  { %p616_p1 = por %p615_p0, %p614_p13 }
 0x264   :  { %p617_p2 = pnand %p616_p1, %p610_p12 }
 0x266   :  { %620 = shalt.err (!%p617_p2)
}
 0x267   :  { %s621_s16 = scalar_lea.hbm %s843_s7, 16 }
 0x268   :  { %p622_p3 = scmp.ne.s32.totalorder %s843_s7, %s621_s16  ;;  %p625_p4 = scmp.lt.u32.totalorder %s621_s16, %s843_s7 }
 0x26a   :  { %p627_p5 = pnand %p625_p4, %p622_p3 }
 0x26c   :  { %630 = shalt.err (!%p627_p5)
}
 0x26d   :  { %445 = dma.vmem_to_hbm [thread:$0]  %s443_s27, 16, %s843_s7, [#allocation5]   ;;  %v311_v1 = vmul.f32 0.3, %v303_v42  ;;  %v315_v46 = vsub.s32 0, %v749_v4  ;;  %v319_v49 = vsub.s32 1, %v749_v4 }
 0x26e   :  { %v356_v47 = vmul.f32 0.3, %v353_v43  ;;  %v402_v48 = vmul.f32 0.3, %v399_v44  ;;  %v672_v50 = vmov 1966171168  }
 0x26f   :  { %v329_v51 = vunpack.c.l.s4 %v672_v50  ;;  %v316_v52 = vrot.slane %v311_v1, %v315_v46  ;;  %v320_v56 = vrot.slane %v311_v1, %v319_v49  ;;  %s673_s7 = smov [#allocation13]  }
 0x270   :  { %v361_v53 = vrot.slane %v356_v47, %v315_v46  ;;  %v407_v54 = vrot.slane %v402_v48, %v315_v46  ;;  %v365_v58 = vrot.slane %v356_v47, %v319_v49  ;;  %v411_v59 = vrot.slane %v402_v48, %v319_v49  ;;  %s462_s5 = sshll.u32 %s673_s7, 4  ;;  %s463_s5 = int_to_ptr.vmem [resolvable:$true] %s462_s5 }
 0x271   :  { %v330_v57 = vunpack.c.0.s8 %v329_v51  ;;  %s631_s22 = scalar_lea.vmem %s463_s5, 128  ;;  %p636_p7 = scmp.lt.s32.totalorder %s463_s5, %s463_s5 }
 0x272   :  { %p632_p6 = scmp.ne.s32.totalorder %s463_s5, %s631_s22  ;;  %p637_p8 = scmp.lt.s32.totalorder %s631_s22, %s631_s22 }
 0x273   :  { %v333_v5 = vsub.s32 %v330_v57, %v749_v4 }
 0x274   :  { %p638_p9 = por %p637_p8, %p636_p7 }
 0x276   :  { %p639_p10 = pnand %p638_p9, %p632_p6 }
 0x328   :  { %v290_v55 = vpop.f32.mrb[0].mxu1 }
 0x329   :  { %v309_v60 = vmul.f32 0.5, %v290_v55  ;;  %v292_v61 = vpop.f32.mrb[1].mxu1 }
 0x32a   :  { %v310_v62 = vmul.f32 0.5, %v292_v61 }
 0x32b   :  { %v323_v63 = vadd.f32 %v316_v52, %v309_v60  ;;  %v368_v0 = vadd.f32 %v361_v53, %v309_v60  ;;  %v414_v2 = vadd.f32 %v407_v54, %v309_v60 }
 0x32c   :  { %v324_v3 = vadd.f32 %v320_v56, %v310_v62  ;;  %v369_v6 = vadd.f32 %v365_v58, %v310_v62  ;;  %v415_v7 = vadd.f32 %v411_v59, %v310_v62 }
 0x32e   :  { %v327_v8 = vcombine.low %v323_v63, %v324_v3  ;;  %v372_v9 = vcombine.low %v368_v0, %v369_v6  ;;  %v418_v10 = vcombine.low %v414_v2, %v415_v7 }
 0x330   :  { %v334_v11 = vrot.slane %v327_v8, %v333_v5  ;;  %v379_v12 = vrot.slane %v372_v9, %v333_v5  ;;  %v425_v13 = vrot.slane %v418_v10, %v333_v5 }
 0x332   :  { %v341_v14 = vrot.slane %v334_v11, %v333_v5  ;;  %v386_v15 = vrot.slane %v379_v12, %v333_v5  ;;  %v432_v16 = vrot.slane %v425_v13, %v333_v5 }
 0x334   :  { %343 = vst.msk [vmem:[#allocation13] ss:$4 sm:$0x3] %vm781_vm7, %v341_v14  ;;  %389 = vst.msk [vmem:[#allocation13 + $0x1] ss:$4 sm:$0x3] %vm781_vm7, %v386_v15 }
 0x335   :  { %435 = vst.msk [vmem:[#allocation13 + $0x2] ss:$4 sm:$0x3] %vm781_vm7, %v432_v16 }
 0x336   :  { %642 = shalt.err (!%p639_p10)
}
 0x337   :  { %s643_s4 = scalar_lea.hbm %s845_s9, 128 }
 0x338   :  { %p644_p11 = scmp.ne.s32.totalorder %s845_s9, %s643_s4  ;;  %p647_p12 = scmp.lt.u32.totalorder %s643_s4, %s845_s9 }
 0x33a   :  { %p649_p13 = pnand %p647_p12, %p644_p11 }
 0x33c   :  { %652 = shalt.err (!%p649_p13)
}
 0x33d   :  { %465 = dma.vmem_to_hbm [thread:$0]  %s463_s5, 128, %s845_s9, [#allocation12]  }
 0x33e   :  { %659 = dma.done.wait [#allocation5], 16  }
 0x33f   :  { %660 = vsyncadd [#allocation5], 4294967280 }
 0x340   :  { %661 = dma.done.wait [#allocation12], 256  }
 0x341   :  { %662 = vsyncadd [#allocation12], 4294967040 }
 0x342   :  { %475 = vsyncpa [#allocation4], 1 }
 0x343   :  { %476 = vsyncpa [#allocation5], 1 }
 0x344   :  { %477 = vsyncpa [#allocation12], 1 }
 0x345   :  { %478 = vsyncpa [#allocation6], 1 }
 0x346   :  { %479 = vsyncpa [#allocation9], 1 }

</bundles_post_ra>
